<compile_context>
chip_gen: v6e
topology: v6e:2x2x1
jax: 0.10.0
libtpu: 0.0.40
codegen_flags: <defaults>
</compile_context>

<pallas_src>
import math
import jax
import jax.numpy as jnp
import numpy as np
from jax.experimental import pallas as pl
from jax.experimental.pallas import tpu as pltpu

EPS = 1e-5  # nn.BatchNorm2d default


# ---------------------------------------------------------------------------
# Kernel 1: 3x3 conv as ONE fused (Cout, 9*Cin) x (9*Cin, NB*4*pw) MXU matmul
# per grid step (batch folded into lanes), output lane-dense with pool-window-
# major lane order, plus per-step partial BN statistics (sum, sum of squares).
# ---------------------------------------------------------------------------
def _make_conv_kernel(nb, cin, cout, hh, wh):
    pw = hh * wh
    blk = 4 * pw

    def kernel(ph_ref, wt_ref, b_ref, out_ref, sum_ref, sq_ref):
        # ph_ref:  (NB, 4, 2, Cin, (hh+1)*wh)   pre-flattened phase views:
        #          ph[n, pr*2+pc, c0, c, i*wh+j] == x_pad[n, c, 2*i+pr, 2*(c0+j)+pc]
        # wt_ref:  (Cout, 9*Cin)                wt[o, (dh*3+dw)*Cin + c] = w[o,c,dh,dw]
        # b_ref:   (Cout, 1)
        # out_ref: (NB, Cout, 4*pw)             lane = q*pw + i*wh + j, q = a*2 + b
        # sum_ref, sq_ref: (1, Cout, 1)         partial BN stats for this step
        base = []
        for n in range(nb):
            d = {}
            for pr in range(2):
                for pc in range(2):
                    for c0 in range(2):
                        d[(pr, pc, c0)] = ph_ref[n, pr * 2 + pc, c0]      # (Cin, L)
            base.append(d)

        # taps: (9*Cin, NB*4*pw); every piece is a pure static lane slice.
        rows = []
        for dh in range(3):
            for dw in range(3):
                pieces = []
                for n in range(nb):
                    for a in range(2):           # pool-window row offset
                        for b in range(2):       # pool-window col offset
                            pr, r0 = (a + dh) % 2, (a + dh) // 2
                            pc, c0 = (b + dw) % 2, (b + dw) // 2
                            v = base[n][(pr, pc, c0)]
                            pieces.append(v[:, r0 * wh:r0 * wh + pw])     # (Cin, pw)
                rows.append(jnp.concatenate(pieces, axis=1))              # (Cin, NB*4*pw)
        taps = jnp.concatenate(rows, axis=0)                              # (9*Cin, NB*4*pw)

        # Single MXU pass, weight as LHS -> result is already (Cout, lanes).
        acc = jnp.dot(wt_ref[...], taps, preferred_element_type=jnp.float32)
        acc = acc + b_ref[...]                                            # (Cout, NB*4*pw)

        for n in range(nb):
            out_ref[n] = acc[:, n * blk:(n + 1) * blk]                    # (Cout, 4*pw)
        sum_ref[0] = jnp.sum(acc, axis=1, keepdims=True)                  # (Cout, 1)
        sq_ref[0] = jnp.sum(acc * acc, axis=1, keepdims=True)

    return kernel


# ---------------------------------------------------------------------------
# Kernel 2: BN affine (precomputed scale/shift), ReLU, 2x2 max-pool.
# Input rows carry FOLD channels each; the pool is 4 static lane slices per
# channel half and the output row is FOLD*pw lanes wide (lane-dense).
# ---------------------------------------------------------------------------
def _make_bn_relu_pool_kernel(fold):
    def kernel(x_ref, sc_ref, sh_ref, out_ref):
        # x_ref:  (TR, fold*4*pw)   sc/sh_ref: (TR, fold)   out_ref: (TR, fold*pw)
        pw = out_ref.shape[1] // fold
        x = x_ref[...]
        sc = sc_ref[...]
        sh = sh_ref[...]
        parts = []
        for p in range(fold):
            y = x[:, p * 4 * pw:(p + 1) * 4 * pw] * sc[:, p:p + 1] + sh[:, p:p + 1]
            y = jnp.maximum(y, 0.0)
            m0 = jnp.maximum(y[:, 0 * pw:1 * pw], y[:, 1 * pw:2 * pw])
            m1 = jnp.maximum(y[:, 2 * pw:3 * pw], y[:, 3 * pw:4 * pw])
            parts.append(jnp.maximum(m0, m1))                            # (TR, pw)
        out_ref[...] = parts[0] if fold == 1 else jnp.concatenate(parts, axis=1)

    return kernel


def conv_block_forward(x_nchw, w_oihw, bias, gamma, beta):
    """ConvBlock forward (pool=True, padding=1). Input/output are NCHW."""
    N, Cin, H, W = x_nchw.shape
    Cout = w_oihw.shape[0]
    assert H % 2 == 0 and W % 2 == 0
    Hh, Wh = H // 2, W // 2
    PW = Hh * Wh
    L = (Hh + 1) * Wh

    # Pre-flattened, column-shifted phase views (static strided XLA slices,
    # tiny at this size).  Every kernel-side patch becomes a pure lane slice.
    # TODO(synk): at large H*W do this split in-kernel with stride-2 pl.ds
    # slices on the padded input to avoid the extra HBM pre-pass.
    x = x_nchw.astype(jnp.float32)
    xp = jnp.pad(x, ((0, 0), (0, 0), (1, 1), (1, 1)))        # (N, Cin, H+2, W+2)
    planes = []
    for pr in range(2):
        for pc in range(2):
            for c0 in range(2):
                v = xp[:, :, pr:pr + 2 * Hh + 1:2,
                       2 * c0 + pc:2 * c0 + pc + 2 * Wh - 1:2]            # (N,Cin,Hh+1,Wh)
                planes.append(v.reshape(N, Cin, L))
    ph = jnp.stack(planes, axis=1).reshape(N, 4, 2, Cin, L)

    wt = (jnp.transpose(w_oihw, (0, 2, 3, 1))                # (Cout, 3, 3, Cin)
          .reshape(Cout, 9 * Cin).astype(jnp.float32))
    b2 = bias.reshape(Cout, 1).astype(jnp.float32)

    # ---- kernel 1: conv + per-step BN partial stats -------------------------
    per_n = (4 * 2 * Cin * L + Cout * 4 * PW + 9 * Cin * 4 * PW + 2 * Cout) * 4
    NB = 1
    while NB * 2 <= N and N % (NB * 2) == 0 and (NB * 2) * per_n <= (8 << 20):
        NB *= 2                                             # fits all VMEM budgets (v5e/v6e/v7x)
    G = N // NB
    # TODO(synk): for N=1..2 on v7x add a second "parallel" grid axis (split
    # Cout or 4*PW) so both TensorCores get work even for one batch element.

    conv_t, psum, psq = pl.pallas_call(
        _make_conv_kernel(NB, Cin, Cout, Hh, Wh),
        out_shape=(jax.ShapeDtypeStruct((N, Cout, 4 * PW), jnp.float32),
                   jax.ShapeDtypeStruct((G, Cout, 1), jnp.float32),
                   jax.ShapeDtypeStruct((G, Cout, 1), jnp.float32)),
        grid_spec=pltpu.PrefetchScalarGridSpec(
            num_scalar_prefetch=0,
            grid=(G,),
            in_specs=[pl.BlockSpec((NB, 4, 2, Cin, L), lambda i: (i, 0, 0, 0, 0)),
                      pl.BlockSpec((Cout, 9 * Cin), lambda i: (0, 0)),
                      pl.BlockSpec((Cout, 1), lambda i: (0, 0))],
            out_specs=(pl.BlockSpec((NB, Cout, 4 * PW), lambda i: (i, 0, 0)),
                       pl.BlockSpec((1, Cout, 1), lambda i: (i, 0, 0)),
                       pl.BlockSpec((1, Cout, 1), lambda i: (i, 0, 0)))),
        compiler_params=pltpu.CompilerParams(
            dimension_semantics=("parallel",)),
    )(ph, wt, b2)

    # BatchNorm2d of a freshly-constructed module runs in training mode:
    # batch mean and *biased* batch variance over (N, H, W), per channel.
    # (E[x^2]-E[x]^2 in f32 is fine at this size; use a two-pass form at scale.)
    # TODO(synk): running_mean/running_var buffer updates are stateful side
    # effects that do not change this forward output; not modeled here.
    cnt = float(N * H * W)
    mean = jnp.sum(psum[:, :, 0], axis=0) / cnt                           # (Cout,)
    var = jnp.sum(psq[:, :, 0], axis=0) / cnt - mean * mean
    inv = gamma.astype(jnp.float32) / jnp.sqrt(var + EPS)
    sft = beta.astype(jnp.float32) - mean * inv

    # ---- kernel 2: BN affine + ReLU + 2x2 max-pool, lane-dense output -------
    FOLD = 2 if Cout % 2 == 0 else 1        # 2 channels/row -> 128-lane-wide output
    ROWS = N * Cout // FOLD
    x2 = conv_t.reshape(ROWS, FOLD * 4 * PW)                # free row-major view
    scale2 = jnp.broadcast_to(inv.reshape(1, Cout // FOLD, FOLD),
                              (N, Cout // FOLD, FOLD)).reshape(ROWS, FOLD)
    shift2 = jnp.broadcast_to(sft.reshape(1, Cout // FOLD, FOLD),
                              (N, Cout // FOLD, FOLD)).reshape(ROWS, FOLD)

    row_b = (FOLD * 4 * PW + FOLD * PW + 2 * FOLD) * 4
    if ROWS % 8 == 0:
        TR = 8
        while TR * 2 <= ROWS and ROWS % (TR * 2) == 0 and (TR * 2) * row_b <= (8 << 20):
            TR *= 2
    else:
        TR = ROWS

    pooled = pl.pallas_call(
        _make_bn_relu_pool_kernel(FOLD),
        out_shape=jax.ShapeDtypeStruct((ROWS, FOLD * PW), jnp.float32),
        grid_spec=pltpu.PrefetchScalarGridSpec(
            num_scalar_prefetch=0,
            grid=(ROWS // TR,),
            in_specs=[pl.BlockSpec((TR, FOLD * 4 * PW), lambda i: (i, 0)),
                      pl.BlockSpec((TR, FOLD), lambda i: (i, 0)),
                      pl.BlockSpec((TR, FOLD), lambda i: (i, 0))],
            out_specs=pl.BlockSpec((TR, FOLD * PW), lambda i: (i, 0))),
        compiler_params=pltpu.CompilerParams(
            dimension_semantics=("parallel",)),
    )(x2, scale2, shift2)

    # (ROWS, FOLD*PW) -> NCHW is a free row-major reshape (no transpose).
    return pooled.reshape(N, Cout, Hh, Wh)


# ---------------------------------------------------------------------------
# Pure-JAX reference (matches PyTorch ConvBlock.forward semantics).
# ---------------------------------------------------------------------------
def _reference(x_nchw, w, b, gamma, beta):
    y = jax.lax.conv_general_dilated(
        x_nchw, w, window_strides=(1, 1), padding=((1, 1), (1, 1)),
        dimension_numbers=('NCHW', 'OIHW', 'NCHW'))
    y = y + b.reshape(1, -1, 1, 1)
    mean = jnp.mean(y, axis=(0, 2, 3), keepdims=True)
    var = jnp.mean((y - mean) ** 2, axis=(0, 2, 3), keepdims=True)
    y = (y - mean) / jnp.sqrt(var + EPS) * gamma.reshape(1, -1, 1, 1) \
        + beta.reshape(1, -1, 1, 1)
    y = jnp.maximum(y, 0.0)
    N, C, H, W = y.shape
    return y.reshape(N, C, H // 2, 2, W // 2, 2).max(axis=(3, 5))


if __name__ == "__main__":
    N, Cin, Cout, H, W = 2, 4, 8, 16, 16
    key = jax.random.PRNGKey(0)
    kx, kw, kb = jax.random.split(key, 3)

    x = jax.random.normal(kx, (N, Cin, H, W), jnp.float32)
    # init_layer(Conv2d): weight ~ N(0, sqrt(2 / (kh*kw*outdim)))
    w = jax.random.normal(kw, (Cout, Cin, 3, 3), jnp.float32) * math.sqrt(2.0 / (9 * Cout))
    # Conv2d bias keeps PyTorch default uniform(-1/sqrt(fan_in), 1/sqrt(fan_in))
    bound = 1.0 / math.sqrt(Cin * 9)
    bias = jax.random.uniform(kb, (Cout,), jnp.float32, -bound, bound)
    # init_layer(BatchNorm2d): weight=1, bias=0
    gamma = jnp.ones((Cout,), jnp.float32)
    beta = jnp.zeros((Cout,), jnp.float32)

    out = jax.jit(conv_block_forward)(x, w, bias, gamma, beta)
    out = jax.block_until_ready(out)

    ref = _reference(x, w, bias, gamma, beta)
    assert out.shape == (N, Cout, H // 2, W // 2)
    np.testing.assert_allclose(np.asarray(out), np.asarray(ref), rtol=1e-3, atol=3e-4)
    print("KERNEL_OK")
</pallas_src>

<mosaic_0001>
module attributes {stable_mosaic.version = 11 : i64} {
  func.func @kernel(%arg0: i32, %arg1: memref<2x4x2x4x72xf32, #tpu.memory_space<vmem>>, %arg2: memref<8x36xf32, #tpu.memory_space<vmem>>, %arg3: memref<8x1xf32, #tpu.memory_space<vmem>>, %arg4: memref<2x8x256xf32, #tpu.memory_space<vmem>>, %arg5: memref<1x8x1xf32, #tpu.memory_space<vmem>>, %arg6: memref<1x8x1xf32, #tpu.memory_space<vmem>>) attributes {dimension_semantics = [#tpu.dimension_semantics<parallel>], iteration_bounds = array<i64: 1>, scalar_prefetch = 0 : i64, scratch_operands = 0 : i64, tpu.core_type = #tpu.core_type<tc>, window_params = [{transform_indices = @transform_0, window_bounds = array<i64: 2, 4, 2, 4, 72>}, {pipeline_mode = #tpu.pipeline_mode<synchronous>, transform_indices = @transform_1, window_bounds = array<i64: 8, 36>}, {pipeline_mode = #tpu.pipeline_mode<synchronous>, transform_indices = @transform_2, window_bounds = array<i64: 8, 1>}, {transform_indices = @transform_3, window_bounds = array<i64: 2, 8, 256>}, {transform_indices = @transform_4, window_bounds = array<i64: 1, 8, 1>}, {transform_indices = @transform_5, window_bounds = array<i64: 1, 8, 1>}]} {
    %c0 = arith.constant 0 : index
    %c0_0 = arith.constant 0 : index
    %c0_1 = arith.constant 0 : index
    %c0_2 = arith.constant 0 : index
    %c0_3 = arith.constant 0 : index
    %0 = vector.load %arg1[%c0, %c0_0, %c0_1, %c0_2, %c0_3] : memref<2x4x2x4x72xf32, #tpu.memory_space<vmem>>, vector<1x1x1x4x72xf32>
    %1 = vector.shape_cast %0 : vector<1x1x1x4x72xf32> to vector<4x72xf32>
    %c0_4 = arith.constant 0 : index
    %c0_5 = arith.constant 0 : index
    %c1 = arith.constant 1 : index
    %c0_6 = arith.constant 0 : index
    %c0_7 = arith.constant 0 : index
    %2 = vector.load %arg1[%c0_4, %c0_5, %c1, %c0_6, %c0_7] : memref<2x4x2x4x72xf32, #tpu.memory_space<vmem>>, vector<1x1x1x4x72xf32>
    %3 = vector.shape_cast %2 : vector<1x1x1x4x72xf32> to vector<4x72xf32>
    %c0_8 = arith.constant 0 : index
    %c1_9 = arith.constant 1 : index
    %c0_10 = arith.constant 0 : index
    %c0_11 = arith.constant 0 : index
    %c0_12 = arith.constant 0 : index
    %4 = vector.load %arg1[%c0_8, %c1_9, %c0_10, %c0_11, %c0_12] : memref<2x4x2x4x72xf32, #tpu.memory_space<vmem>>, vector<1x1x1x4x72xf32>
    %5 = vector.shape_cast %4 : vector<1x1x1x4x72xf32> to vector<4x72xf32>
    %c0_13 = arith.constant 0 : index
    %c1_14 = arith.constant 1 : index
    %c1_15 = arith.constant 1 : index
    %c0_16 = arith.constant 0 : index
    %c0_17 = arith.constant 0 : index
    %6 = vector.load %arg1[%c0_13, %c1_14, %c1_15, %c0_16, %c0_17] : memref<2x4x2x4x72xf32, #tpu.memory_space<vmem>>, vector<1x1x1x4x72xf32>
    %7 = vector.shape_cast %6 : vector<1x1x1x4x72xf32> to vector<4x72xf32>
    %c0_18 = arith.constant 0 : index
    %c2 = arith.constant 2 : index
    %c0_19 = arith.constant 0 : index
    %c0_20 = arith.constant 0 : index
    %c0_21 = arith.constant 0 : index
    %8 = vector.load %arg1[%c0_18, %c2, %c0_19, %c0_20, %c0_21] : memref<2x4x2x4x72xf32, #tpu.memory_space<vmem>>, vector<1x1x1x4x72xf32>
    %9 = vector.shape_cast %8 : vector<1x1x1x4x72xf32> to vector<4x72xf32>
    %c0_22 = arith.constant 0 : index
    %c2_23 = arith.constant 2 : index
    %c1_24 = arith.constant 1 : index
    %c0_25 = arith.constant 0 : index
    %c0_26 = arith.constant 0 : index
    %10 = vector.load %arg1[%c0_22, %c2_23, %c1_24, %c0_25, %c0_26] : memref<2x4x2x4x72xf32, #tpu.memory_space<vmem>>, vector<1x1x1x4x72xf32>
    %11 = vector.shape_cast %10 : vector<1x1x1x4x72xf32> to vector<4x72xf32>
    %c0_27 = arith.constant 0 : index
    %c3 = arith.constant 3 : index
    %c0_28 = arith.constant 0 : index
    %c0_29 = arith.constant 0 : index
    %c0_30 = arith.constant 0 : index
    %12 = vector.load %arg1[%c0_27, %c3, %c0_28, %c0_29, %c0_30] : memref<2x4x2x4x72xf32, #tpu.memory_space<vmem>>, vector<1x1x1x4x72xf32>
    %13 = vector.shape_cast %12 : vector<1x1x1x4x72xf32> to vector<4x72xf32>
    %c0_31 = arith.constant 0 : index
    %c3_32 = arith.constant 3 : index
    %c1_33 = arith.constant 1 : index
    %c0_34 = arith.constant 0 : index
    %c0_35 = arith.constant 0 : index
    %14 = vector.load %arg1[%c0_31, %c3_32, %c1_33, %c0_34, %c0_35] : memref<2x4x2x4x72xf32, #tpu.memory_space<vmem>>, vector<1x1x1x4x72xf32>
    %15 = vector.shape_cast %14 : vector<1x1x1x4x72xf32> to vector<4x72xf32>
    %c1_36 = arith.constant 1 : index
    %c0_37 = arith.constant 0 : index
    %c0_38 = arith.constant 0 : index
    %c0_39 = arith.constant 0 : index
    %c0_40 = arith.constant 0 : index
    %16 = vector.load %arg1[%c1_36, %c0_37, %c0_38, %c0_39, %c0_40] : memref<2x4x2x4x72xf32, #tpu.memory_space<vmem>>, vector<1x1x1x4x72xf32>
    %17 = vector.shape_cast %16 : vector<1x1x1x4x72xf32> to vector<4x72xf32>
    %c1_41 = arith.constant 1 : index
    %c0_42 = arith.constant 0 : index
    %c1_43 = arith.constant 1 : index
    %c0_44 = arith.constant 0 : index
    %c0_45 = arith.constant 0 : index
    %18 = vector.load %arg1[%c1_41, %c0_42, %c1_43, %c0_44, %c0_45] : memref<2x4x2x4x72xf32, #tpu.memory_space<vmem>>, vector<1x1x1x4x72xf32>
    %19 = vector.shape_cast %18 : vector<1x1x1x4x72xf32> to vector<4x72xf32>
    %c1_46 = arith.constant 1 : index
    %c1_47 = arith.constant 1 : index
    %c0_48 = arith.constant 0 : index
    %c0_49 = arith.constant 0 : index
    %c0_50 = arith.constant 0 : index
    %20 = vector.load %arg1[%c1_46, %c1_47, %c0_48, %c0_49, %c0_50] : memref<2x4x2x4x72xf32, #tpu.memory_space<vmem>>, vector<1x1x1x4x72xf32>
    %21 = vector.shape_cast %20 : vector<1x1x1x4x72xf32> to vector<4x72xf32>
    %c1_51 = arith.constant 1 : index
    %c1_52 = arith.constant 1 : index
    %c1_53 = arith.constant 1 : index
    %c0_54 = arith.constant 0 : index
    %c0_55 = arith.constant 0 : index
    %22 = vector.load %arg1[%c1_51, %c1_52, %c1_53, %c0_54, %c0_55] : memref<2x4x2x4x72xf32, #tpu.memory_space<vmem>>, vector<1x1x1x4x72xf32>
    %23 = vector.shape_cast %22 : vector<1x1x1x4x72xf32> to vector<4x72xf32>
    %c1_56 = arith.constant 1 : index
    %c2_57 = arith.constant 2 : index
    %c0_58 = arith.constant 0 : index
    %c0_59 = arith.constant 0 : index
    %c0_60 = arith.constant 0 : index
    %24 = vector.load %arg1[%c1_56, %c2_57, %c0_58, %c0_59, %c0_60] : memref<2x4x2x4x72xf32, #tpu.memory_space<vmem>>, vector<1x1x1x4x72xf32>
    %25 = vector.shape_cast %24 : vector<1x1x1x4x72xf32> to vector<4x72xf32>
    %c1_61 = arith.constant 1 : index
    %c2_62 = arith.constant 2 : index
    %c1_63 = arith.constant 1 : index
    %c0_64 = arith.constant 0 : index
    %c0_65 = arith.constant 0 : index
    %26 = vector.load %arg1[%c1_61, %c2_62, %c1_63, %c0_64, %c0_65] : memref<2x4x2x4x72xf32, #tpu.memory_space<vmem>>, vector<1x1x1x4x72xf32>
    %27 = vector.shape_cast %26 : vector<1x1x1x4x72xf32> to vector<4x72xf32>
    %c1_66 = arith.constant 1 : index
    %c3_67 = arith.constant 3 : index
    %c0_68 = arith.constant 0 : index
    %c0_69 = arith.constant 0 : index
    %c0_70 = arith.constant 0 : index
    %28 = vector.load %arg1[%c1_66, %c3_67, %c0_68, %c0_69, %c0_70] : memref<2x4x2x4x72xf32, #tpu.memory_space<vmem>>, vector<1x1x1x4x72xf32>
    %29 = vector.shape_cast %28 : vector<1x1x1x4x72xf32> to vector<4x72xf32>
    %c1_71 = arith.constant 1 : index
    %c3_72 = arith.constant 3 : index
    %c1_73 = arith.constant 1 : index
    %c0_74 = arith.constant 0 : index
    %c0_75 = arith.constant 0 : index
    %30 = vector.load %arg1[%c1_71, %c3_72, %c1_73, %c0_74, %c0_75] : memref<2x4x2x4x72xf32, #tpu.memory_space<vmem>>, vector<1x1x1x4x72xf32>
    %31 = vector.shape_cast %30 : vector<1x1x1x4x72xf32> to vector<4x72xf32>
    %32 = vector.extract_strided_slice %1 {offsets = [0, 0], sizes = [4, 64], strides = [1, 1]} : vector<4x72xf32> to vector<4x64xf32>
    %33 = vector.extract_strided_slice %5 {offsets = [0, 0], sizes = [4, 64], strides = [1, 1]} : vector<4x72xf32> to vector<4x64xf32>
    %34 = vector.extract_strided_slice %9 {offsets = [0, 0], sizes = [4, 64], strides = [1, 1]} : vector<4x72xf32> to vector<4x64xf32>
    %35 = vector.extract_strided_slice %13 {offsets = [0, 0], sizes = [4, 64], strides = [1, 1]} : vector<4x72xf32> to vector<4x64xf32>
    %36 = vector.extract_strided_slice %17 {offsets = [0, 0], sizes = [4, 64], strides = [1, 1]} : vector<4x72xf32> to vector<4x64xf32>
    %37 = vector.extract_strided_slice %21 {offsets = [0, 0], sizes = [4, 64], strides = [1, 1]} : vector<4x72xf32> to vector<4x64xf32>
    %38 = vector.extract_strided_slice %25 {offsets = [0, 0], sizes = [4, 64], strides = [1, 1]} : vector<4x72xf32> to vector<4x64xf32>
    %39 = vector.extract_strided_slice %29 {offsets = [0, 0], sizes = [4, 64], strides = [1, 1]} : vector<4x72xf32> to vector<4x64xf32>
    %40 = tpu.concatenate %32, %33, %34, %35, %36, %37, %38, %39 in 1 : vector<4x64xf32>, vector<4x64xf32>, vector<4x64xf32>, vector<4x64xf32>, vector<4x64xf32>, vector<4x64xf32>, vector<4x64xf32>, vector<4x64xf32> -> vector<4x512xf32>
    %41 = vector.extract_strided_slice %5 {offsets = [0, 0], sizes = [4, 64], strides = [1, 1]} : vector<4x72xf32> to vector<4x64xf32>
    %42 = vector.extract_strided_slice %3 {offsets = [0, 0], sizes = [4, 64], strides = [1, 1]} : vector<4x72xf32> to vector<4x64xf32>
    %43 = vector.extract_strided_slice %13 {offsets = [0, 0], sizes = [4, 64], strides = [1, 1]} : vector<4x72xf32> to vector<4x64xf32>
    %44 = vector.extract_strided_slice %11 {offsets = [0, 0], sizes = [4, 64], strides = [1, 1]} : vector<4x72xf32> to vector<4x64xf32>
    %45 = vector.extract_strided_slice %21 {offsets = [0, 0], sizes = [4, 64], strides = [1, 1]} : vector<4x72xf32> to vector<4x64xf32>
    %46 = vector.extract_strided_slice %19 {offsets = [0, 0], sizes = [4, 64], strides = [1, 1]} : vector<4x72xf32> to vector<4x64xf32>
    %47 = vector.extract_strided_slice %29 {offsets = [0, 0], sizes = [4, 64], strides = [1, 1]} : vector<4x72xf32> to vector<4x64xf32>
    %48 = vector.extract_strided_slice %27 {offsets = [0, 0], sizes = [4, 64], strides = [1, 1]} : vector<4x72xf32> to vector<4x64xf32>
    %49 = tpu.concatenate %41, %42, %43, %44, %45, %46, %47, %48 in 1 : vector<4x64xf32>, vector<4x64xf32>, vector<4x64xf32>, vector<4x64xf32>, vector<4x64xf32>, vector<4x64xf32>, vector<4x64xf32>, vector<4x64xf32> -> vector<4x512xf32>
    %50 = vector.extract_strided_slice %3 {offsets = [0, 0], sizes = [4, 64], strides = [1, 1]} : vector<4x72xf32> to vector<4x64xf32>
    %51 = vector.extract_strided_slice %7 {offsets = [0, 0], sizes = [4, 64], strides = [1, 1]} : vector<4x72xf32> to vector<4x64xf32>
    %52 = vector.extract_strided_slice %11 {offsets = [0, 0], sizes = [4, 64], strides = [1, 1]} : vector<4x72xf32> to vector<4x64xf32>
    %53 = vector.extract_strided_slice %15 {offsets = [0, 0], sizes = [4, 64], strides = [1, 1]} : vector<4x72xf32> to vector<4x64xf32>
    %54 = vector.extract_strided_slice %19 {offsets = [0, 0], sizes = [4, 64], strides = [1, 1]} : vector<4x72xf32> to vector<4x64xf32>
    %55 = vector.extract_strided_slice %23 {offsets = [0, 0], sizes = [4, 64], strides = [1, 1]} : vector<4x72xf32> to vector<4x64xf32>
    %56 = vector.extract_strided_slice %27 {offsets = [0, 0], sizes = [4, 64], strides = [1, 1]} : vector<4x72xf32> to vector<4x64xf32>
    %57 = vector.extract_strided_slice %31 {offsets = [0, 0], sizes = [4, 64], strides = [1, 1]} : vector<4x72xf32> to vector<4x64xf32>
    %58 = tpu.concatenate %50, %51, %52, %53, %54, %55, %56, %57 in 1 : vector<4x64xf32>, vector<4x64xf32>, vector<4x64xf32>, vector<4x64xf32>, vector<4x64xf32>, vector<4x64xf32>, vector<4x64xf32>, vector<4x64xf32> -> vector<4x512xf32>
    %59 = vector.extract_strided_slice %9 {offsets = [0, 0], sizes = [4, 64], strides = [1, 1]} : vector<4x72xf32> to vector<4x64xf32>
    %60 = vector.extract_strided_slice %13 {offsets = [0, 0], sizes = [4, 64], strides = [1, 1]} : vector<4x72xf32> to vector<4x64xf32>
    %61 = vector.extract_strided_slice %1 {offsets = [0, 8], sizes = [4, 64], strides = [1, 1]} : vector<4x72xf32> to vector<4x64xf32>
    %62 = vector.extract_strided_slice %5 {offsets = [0, 8], sizes = [4, 64], strides = [1, 1]} : vector<4x72xf32> to vector<4x64xf32>
    %63 = vector.extract_strided_slice %25 {offsets = [0, 0], sizes = [4, 64], strides = [1, 1]} : vector<4x72xf32> to vector<4x64xf32>
    %64 = vector.extract_strided_slice %29 {offsets = [0, 0], sizes = [4, 64], strides = [1, 1]} : vector<4x72xf32> to vector<4x64xf32>
    %65 = vector.extract_strided_slice %17 {offsets = [0, 8], sizes = [4, 64], strides = [1, 1]} : vector<4x72xf32> to vector<4x64xf32>
    %66 = vector.extract_strided_slice %21 {offsets = [0, 8], sizes = [4, 64], strides = [1, 1]} : vector<4x72xf32> to vector<4x64xf32>
    %67 = tpu.concatenate %59, %60, %61, %62, %63, %64, %65, %66 in 1 : vector<4x64xf32>, vector<4x64xf32>, vector<4x64xf32>, vector<4x64xf32>, vector<4x64xf32>, vector<4x64xf32>, vector<4x64xf32>, vector<4x64xf32> -> vector<4x512xf32>
    %68 = vector.extract_strided_slice %13 {offsets = [0, 0], sizes = [4, 64], strides = [1, 1]} : vector<4x72xf32> to vector<4x64xf32>
    %69 = vector.extract_strided_slice %11 {offsets = [0, 0], sizes = [4, 64], strides = [1, 1]} : vector<4x72xf32> to vector<4x64xf32>
    %70 = vector.extract_strided_slice %5 {offsets = [0, 8], sizes = [4, 64], strides = [1, 1]} : vector<4x72xf32> to vector<4x64xf32>
    %71 = vector.extract_strided_slice %3 {offsets = [0, 8], sizes = [4, 64], strides = [1, 1]} : vector<4x72xf32> to vector<4x64xf32>
    %72 = vector.extract_strided_slice %29 {offsets = [0, 0], sizes = [4, 64], strides = [1, 1]} : vector<4x72xf32> to vector<4x64xf32>
    %73 = vector.extract_strided_slice %27 {offsets = [0, 0], sizes = [4, 64], strides = [1, 1]} : vector<4x72xf32> to vector<4x64xf32>
    %74 = vector.extract_strided_slice %21 {offsets = [0, 8], sizes = [4, 64], strides = [1, 1]} : vector<4x72xf32> to vector<4x64xf32>
    %75 = vector.extract_strided_slice %19 {offsets = [0, 8], sizes = [4, 64], strides = [1, 1]} : vector<4x72xf32> to vector<4x64xf32>
    %76 = tpu.concatenate %68, %69, %70, %71, %72, %73, %74, %75 in 1 : vector<4x64xf32>, vector<4x64xf32>, vector<4x64xf32>, vector<4x64xf32>, vector<4x64xf32>, vector<4x64xf32>, vector<4x64xf32>, vector<4x64xf32> -> vector<4x512xf32>
    %77 = vector.extract_strided_slice %11 {offsets = [0, 0], sizes = [4, 64], strides = [1, 1]} : vector<4x72xf32> to vector<4x64xf32>
    %78 = vector.extract_strided_slice %15 {offsets = [0, 0], sizes = [4, 64], strides = [1, 1]} : vector<4x72xf32> to vector<4x64xf32>
    %79 = vector.extract_strided_slice %3 {offsets = [0, 8], sizes = [4, 64], strides = [1, 1]} : vector<4x72xf32> to vector<4x64xf32>
    %80 = vector.extract_strided_slice %7 {offsets = [0, 8], sizes = [4, 64], strides = [1, 1]} : vector<4x72xf32> to vector<4x64xf32>
    %81 = vector.extract_strided_slice %27 {offsets = [0, 0], sizes = [4, 64], strides = [1, 1]} : vector<4x72xf32> to vector<4x64xf32>
    %82 = vector.extract_strided_slice %31 {offsets = [0, 0], sizes = [4, 64], strides = [1, 1]} : vector<4x72xf32> to vector<4x64xf32>
    %83 = vector.extract_strided_slice %19 {offsets = [0, 8], sizes = [4, 64], strides = [1, 1]} : vector<4x72xf32> to vector<4x64xf32>
    %84 = vector.extract_strided_slice %23 {offsets = [0, 8], sizes = [4, 64], strides = [1, 1]} : vector<4x72xf32> to vector<4x64xf32>
    %85 = tpu.concatenate %77, %78, %79, %80, %81, %82, %83, %84 in 1 : vector<4x64xf32>, vector<4x64xf32>, vector<4x64xf32>, vector<4x64xf32>, vector<4x64xf32>, vector<4x64xf32>, vector<4x64xf32>, vector<4x64xf32> -> vector<4x512xf32>
    %86 = vector.extract_strided_slice %1 {offsets = [0, 8], sizes = [4, 64], strides = [1, 1]} : vector<4x72xf32> to vector<4x64xf32>
    %87 = vector.extract_strided_slice %5 {offsets = [0, 8], sizes = [4, 64], strides = [1, 1]} : vector<4x72xf32> to vector<4x64xf32>
    %88 = vector.extract_strided_slice %9 {offsets = [0, 8], sizes = [4, 64], strides = [1, 1]} : vector<4x72xf32> to vector<4x64xf32>
    %89 = vector.extract_strided_slice %13 {offsets = [0, 8], sizes = [4, 64], strides = [1, 1]} : vector<4x72xf32> to vector<4x64xf32>
    %90 = vector.extract_strided_slice %17 {offsets = [0, 8], sizes = [4, 64], strides = [1, 1]} : vector<4x72xf32> to vector<4x64xf32>
    %91 = vector.extract_strided_slice %21 {offsets = [0, 8], sizes = [4, 64], strides = [1, 1]} : vector<4x72xf32> to vector<4x64xf32>
    %92 = vector.extract_strided_slice %25 {offsets = [0, 8], sizes = [4, 64], strides = [1, 1]} : vector<4x72xf32> to vector<4x64xf32>
    %93 = vector.extract_strided_slice %29 {offsets = [0, 8], sizes = [4, 64], strides = [1, 1]} : vector<4x72xf32> to vector<4x64xf32>
    %94 = tpu.concatenate %86, %87, %88, %89, %90, %91, %92, %93 in 1 : vector<4x64xf32>, vector<4x64xf32>, vector<4x64xf32>, vector<4x64xf32>, vector<4x64xf32>, vector<4x64xf32>, vector<4x64xf32>, vector<4x64xf32> -> vector<4x512xf32>
    %95 = vector.extract_strided_slice %5 {offsets = [0, 8], sizes = [4, 64], strides = [1, 1]} : vector<4x72xf32> to vector<4x64xf32>
    %96 = vector.extract_strided_slice %3 {offsets = [0, 8], sizes = [4, 64], strides = [1, 1]} : vector<4x72xf32> to vector<4x64xf32>
    %97 = vector.extract_strided_slice %13 {offsets = [0, 8], sizes = [4, 64], strides = [1, 1]} : vector<4x72xf32> to vector<4x64xf32>
    %98 = vector.extract_strided_slice %11 {offsets = [0, 8], sizes = [4, 64], strides = [1, 1]} : vector<4x72xf32> to vector<4x64xf32>
    %99 = vector.extract_strided_slice %21 {offsets = [0, 8], sizes = [4, 64], strides = [1, 1]} : vector<4x72xf32> to vector<4x64xf32>
    %100 = vector.extract_strided_slice %19 {offsets = [0, 8], sizes = [4, 64], strides = [1, 1]} : vector<4x72xf32> to vector<4x64xf32>
    %101 = vector.extract_strided_slice %29 {offsets = [0, 8], sizes = [4, 64], strides = [1, 1]} : vector<4x72xf32> to vector<4x64xf32>
    %102 = vector.extract_strided_slice %27 {offsets = [0, 8], sizes = [4, 64], strides = [1, 1]} : vector<4x72xf32> to vector<4x64xf32>
    %103 = tpu.concatenate %95, %96, %97, %98, %99, %100, %101, %102 in 1 : vector<4x64xf32>, vector<4x64xf32>, vector<4x64xf32>, vector<4x64xf32>, vector<4x64xf32>, vector<4x64xf32>, vector<4x64xf32>, vector<4x64xf32> -> vector<4x512xf32>
    %104 = vector.extract_strided_slice %3 {offsets = [0, 8], sizes = [4, 64], strides = [1, 1]} : vector<4x72xf32> to vector<4x64xf32>
    %105 = vector.extract_strided_slice %7 {offsets = [0, 8], sizes = [4, 64], strides = [1, 1]} : vector<4x72xf32> to vector<4x64xf32>
    %106 = vector.extract_strided_slice %11 {offsets = [0, 8], sizes = [4, 64], strides = [1, 1]} : vector<4x72xf32> to vector<4x64xf32>
    %107 = vector.extract_strided_slice %15 {offsets = [0, 8], sizes = [4, 64], strides = [1, 1]} : vector<4x72xf32> to vector<4x64xf32>
    %108 = vector.extract_strided_slice %19 {offsets = [0, 8], sizes = [4, 64], strides = [1, 1]} : vector<4x72xf32> to vector<4x64xf32>
    %109 = vector.extract_strided_slice %23 {offsets = [0, 8], sizes = [4, 64], strides = [1, 1]} : vector<4x72xf32> to vector<4x64xf32>
    %110 = vector.extract_strided_slice %27 {offsets = [0, 8], sizes = [4, 64], strides = [1, 1]} : vector<4x72xf32> to vector<4x64xf32>
    %111 = vector.extract_strided_slice %31 {offsets = [0, 8], sizes = [4, 64], strides = [1, 1]} : vector<4x72xf32> to vector<4x64xf32>
    %112 = tpu.concatenate %104, %105, %106, %107, %108, %109, %110, %111 in 1 : vector<4x64xf32>, vector<4x64xf32>, vector<4x64xf32>, vector<4x64xf32>, vector<4x64xf32>, vector<4x64xf32>, vector<4x64xf32>, vector<4x64xf32> -> vector<4x512xf32>
    %113 = tpu.concatenate %40, %49, %58, %67, %76, %85, %94, %103, %112 in 0 : vector<4x512xf32>, vector<4x512xf32>, vector<4x512xf32>, vector<4x512xf32>, vector<4x512xf32>, vector<4x512xf32>, vector<4x512xf32>, vector<4x512xf32>, vector<4x512xf32> -> vector<36x512xf32>
    %c0_76 = arith.constant 0 : index
    %c0_77 = arith.constant 0 : index
    %114 = vector.load %arg2[%c0_76, %c0_77] : memref<8x36xf32, #tpu.memory_space<vmem>>, vector<8x36xf32>
    %cst = arith.constant dense<0.000000e+00> : vector<8x512xf32>
    %115 = tpu.matmul %114, %113, %cst {dimension_numbers = #tpu.dot_dimension_numbers<[1], [0], [0], [1], [0, 0, 1, 1], [], []>} : vector<8x36xf32>, vector<36x512xf32>, vector<8x512xf32> -> vector<8x512xf32>
    %c0_78 = arith.constant 0 : index
    %c0_79 = arith.constant 0 : index
    %116 = vector.load %arg3[%c0_78, %c0_79] : memref<8x1xf32, #tpu.memory_space<vmem>>, vector<8x1xf32>
    %117 = vector.broadcast %116 : vector<8x1xf32> to vector<8x512xf32>
    %118 = arith.addf %115, %117 : vector<8x512xf32>
    %119 = vector.extract_strided_slice %118 {offsets = [0, 0], sizes = [8, 256], strides = [1, 1]} : vector<8x512xf32> to vector<8x256xf32>
    %c0_80 = arith.constant 0 : index
    %c0_81 = arith.constant 0 : index
    %c0_82 = arith.constant 0 : index
    %120 = vector.load %arg4[%c0_80, %c0_81, %c0_82] : memref<2x8x256xf32, #tpu.memory_space<vmem>>, vector<1x8x256xf32>
    %121 = vector.shape_cast %120 : vector<1x8x256xf32> to vector<8x256xf32>
    %122 = vector.shape_cast %119 : vector<8x256xf32> to vector<1x8x256xf32>
    tpu.vector_store %arg4[%c0_80, %c0_81, %c0_82], %122 {strides = array<i32>} : memref<2x8x256xf32, #tpu.memory_space<vmem>>, vector<1x8x256xf32>,
    %123 = vector.extract_strided_slice %118 {offsets = [0, 256], sizes = [8, 256], strides = [1, 1]} : vector<8x512xf32> to vector<8x256xf32>
    %c1_83 = arith.constant 1 : index
    %c0_84 = arith.constant 0 : index
    %c0_85 = arith.constant 0 : index
    %124 = vector.load %arg4[%c1_83, %c0_84, %c0_85] : memref<2x8x256xf32, #tpu.memory_space<vmem>>, vector<1x8x256xf32>
    %125 = vector.shape_cast %124 : vector<1x8x256xf32> to vector<8x256xf32>
    %126 = vector.shape_cast %123 : vector<8x256xf32> to vector<1x8x256xf32>
    tpu.vector_store %arg4[%c1_83, %c0_84, %c0_85], %126 {strides = array<i32>} : memref<2x8x256xf32, #tpu.memory_space<vmem>>, vector<1x8x256xf32>,
    %cst_86 = arith.constant dense<0.000000e+00> : vector<8xf32>
    %127 = vector.multi_reduction <add>, %118, %cst_86 [1] : vector<8x512xf32> to vector<8xf32>
    %128 = vector.shape_cast %127 : vector<8xf32> to vector<8x1xf32>
    %c0_87 = arith.constant 0 : index
    %c0_88 = arith.constant 0 : index
    %c0_89 = arith.constant 0 : index
    %129 = vector.load %arg5[%c0_87, %c0_88, %c0_89] : memref<1x8x1xf32, #tpu.memory_space<vmem>>, vector<1x8x1xf32>
    %130 = vector.shape_cast %129 : vector<1x8x1xf32> to vector<8x1xf32>
    %131 = vector.shape_cast %128 : vector<8x1xf32> to vector<1x8x1xf32>
    tpu.vector_store %arg5[%c0_87, %c0_88, %c0_89], %131 {strides = array<i32>} : memref<1x8x1xf32, #tpu.memory_space<vmem>>, vector<1x8x1xf32>,
    %132 = arith.mulf %118, %118 : vector<8x512xf32>
    %cst_90 = arith.constant dense<0.000000e+00> : vector<8xf32>
    %133 = vector.multi_reduction <add>, %132, %cst_90 [1] : vector<8x512xf32> to vector<8xf32>
    %134 = vector.shape_cast %133 : vector<8xf32> to vector<8x1xf32>
    %c0_91 = arith.constant 0 : index
    %c0_92 = arith.constant 0 : index
    %c0_93 = arith.constant 0 : index
    %135 = vector.load %arg6[%c0_91, %c0_92, %c0_93] : memref<1x8x1xf32, #tpu.memory_space<vmem>>, vector<1x8x1xf32>
    %136 = vector.shape_cast %135 : vector<1x8x1xf32> to vector<8x1xf32>
    %137 = vector.shape_cast %134 : vector<8x1xf32> to vector<1x8x1xf32>
    tpu.vector_store %arg6[%c0_91, %c0_92, %c0_93], %137 {strides = array<i32>} : memref<1x8x1xf32, #tpu.memory_space<vmem>>, vector<1x8x1xf32>,
    return
  }
  func.func @transform_0(%arg0: i32) -> (i32, i32, i32, i32, i32) {
    %c0_i32 = arith.constant 0 : i32
    %c0_i32_0 = arith.constant 0 : i32
    %c0_i32_1 = arith.constant 0 : i32
    %c0_i32_2 = arith.constant 0 : i32
    %c0_i32_3 = arith.constant 0 : i32
    return %arg0, %c0_i32, %c0_i32_0, %c0_i32_1, %c0_i32_2 : i32, i32, i32, i32, i32
  }
  func.func @transform_1(%arg0: i32) -> (i32, i32) {
    %c0_i32 = arith.constant 0 : i32
    %c0_i32_0 = arith.constant 0 : i32
    %c0_i32_1 = arith.constant 0 : i32
    return %c0_i32, %c0_i32_0 : i32, i32
  }
  func.func @transform_2(%arg0: i32) -> (i32, i32) {
    %c0_i32 = arith.constant 0 : i32
    %c0_i32_0 = arith.constant 0 : i32
    %c0_i32_1 = arith.constant 0 : i32
    return %c0_i32, %c0_i32_0 : i32, i32
  }
  func.func @transform_3(%arg0: i32) -> (i32, i32, i32) {
    %c0_i32 = arith.constant 0 : i32
    %c0_i32_0 = arith.constant 0 : i32
    %c0_i32_1 = arith.constant 0 : i32
    return %arg0, %c0_i32, %c0_i32_0 : i32, i32, i32
  }
  func.func @transform_4(%arg0: i32) -> (i32, i32, i32) {
    %c0_i32 = arith.constant 0 : i32
    %c0_i32_0 = arith.constant 0 : i32
    %c0_i32_1 = arith.constant 0 : i32
    return %arg0, %c0_i32, %c0_i32_0 : i32, i32, i32
  }
  func.func @transform_5(%arg0: i32) -> (i32, i32, i32) {
    %c0_i32 = arith.constant 0 : i32
    %c0_i32_0 = arith.constant 0 : i32
    %c0_i32_1 = arith.constant 0 : i32
    return %arg0, %c0_i32, %c0_i32_0 : i32, i32, i32
  }
}

module attributes {stable_mosaic.version = 11 : i64} {
  func.func @kernel(%arg0: i32, %arg1: memref<8x512xf32, #tpu.memory_space<vmem>>, %arg2: memref<8x2xf32, #tpu.memory_space<vmem>>, %arg3: memref<8x2xf32, #tpu.memory_space<vmem>>, %arg4: memref<8x128xf32, #tpu.memory_space<vmem>>) attributes {dimension_semantics = [#tpu.dimension_semantics<parallel>], iteration_bounds = array<i64: 1>, scalar_prefetch = 0 : i64, scratch_operands = 0 : i64, tpu.core_type = #tpu.core_type<tc>, window_params = [{transform_indices = @transform_0, window_bounds = array<i64: 8, 512>}, {transform_indices = @transform_1, window_bounds = array<i64: 8, 2>}, {transform_indices = @transform_2, window_bounds = array<i64: 8, 2>}, {transform_indices = @transform_3, window_bounds = array<i64: 8, 128>}]} {
    %c0 = arith.constant 0 : index
    %c0_0 = arith.constant 0 : index
    %0 = vector.load %arg1[%c0, %c0_0] : memref<8x512xf32, #tpu.memory_space<vmem>>, vector<8x512xf32>
    %c0_1 = arith.constant 0 : index
    %c0_2 = arith.constant 0 : index
    %1 = vector.load %arg2[%c0_1, %c0_2] : memref<8x2xf32, #tpu.memory_space<vmem>>, vector<8x2xf32>
    %c0_3 = arith.constant 0 : index
    %c0_4 = arith.constant 0 : index
    %2 = vector.load %arg3[%c0_3, %c0_4] : memref<8x2xf32, #tpu.memory_space<vmem>>, vector<8x2xf32>
    %3 = vector.extract_strided_slice %0 {offsets = [0, 0], sizes = [8, 256], strides = [1, 1]} : vector<8x512xf32> to vector<8x256xf32>
    %4 = vector.extract_strided_slice %1 {offsets = [0, 0], sizes = [8, 1], strides = [1, 1]} : vector<8x2xf32> to vector<8x1xf32>
    %5 = vector.broadcast %4 : vector<8x1xf32> to vector<8x256xf32>
    %6 = arith.mulf %3, %5 : vector<8x256xf32>
    %7 = vector.extract_strided_slice %2 {offsets = [0, 0], sizes = [8, 1], strides = [1, 1]} : vector<8x2xf32> to vector<8x1xf32>
    %8 = vector.broadcast %7 : vector<8x1xf32> to vector<8x256xf32>
    %9 = arith.addf %6, %8 : vector<8x256xf32>
    %cst = arith.constant 0.000000e+00 : f32
    %10 = vector.broadcast %cst : f32 to vector<8x256xf32>
    %11 = arith.maximumf %9, %10 : vector<8x256xf32>
    %12 = vector.extract_strided_slice %11 {offsets = [0, 0], sizes = [8, 64], strides = [1, 1]} : vector<8x256xf32> to vector<8x64xf32>
    %13 = vector.extract_strided_slice %11 {offsets = [0, 64], sizes = [8, 64], strides = [1, 1]} : vector<8x256xf32> to vector<8x64xf32>
    %14 = arith.maximumf %12, %13 : vector<8x64xf32>
    %15 = vector.extract_strided_slice %11 {offsets = [0, 128], sizes = [8, 64], strides = [1, 1]} : vector<8x256xf32> to vector<8x64xf32>
    %16 = vector.extract_strided_slice %11 {offsets = [0, 192], sizes = [8, 64], strides = [1, 1]} : vector<8x256xf32> to vector<8x64xf32>
    %17 = arith.maximumf %15, %16 : vector<8x64xf32>
    %18 = arith.maximumf %14, %17 : vector<8x64xf32>
    %19 = vector.extract_strided_slice %0 {offsets = [0, 256], sizes = [8, 256], strides = [1, 1]} : vector<8x512xf32> to vector<8x256xf32>
    %20 = vector.extract_strided_slice %1 {offsets = [0, 1], sizes = [8, 1], strides = [1, 1]} : vector<8x2xf32> to vector<8x1xf32>
    %21 = vector.broadcast %20 : vector<8x1xf32> to vector<8x256xf32>
    %22 = arith.mulf %19, %21 : vector<8x256xf32>
    %23 = vector.extract_strided_slice %2 {offsets = [0, 1], sizes = [8, 1], strides = [1, 1]} : vector<8x2xf32> to vector<8x1xf32>
    %24 = vector.broadcast %23 : vector<8x1xf32> to vector<8x256xf32>
    %25 = arith.addf %22, %24 : vector<8x256xf32>
    %cst_5 = arith.constant 0.000000e+00 : f32
    %26 = vector.broadcast %cst_5 : f32 to vector<8x256xf32>
    %27 = arith.maximumf %25, %26 : vector<8x256xf32>
    %28 = vector.extract_strided_slice %27 {offsets = [0, 0], sizes = [8, 64], strides = [1, 1]} : vector<8x256xf32> to vector<8x64xf32>
    %29 = vector.extract_strided_slice %27 {offsets = [0, 64], sizes = [8, 64], strides = [1, 1]} : vector<8x256xf32> to vector<8x64xf32>
    %30 = arith.maximumf %28, %29 : vector<8x64xf32>
    %31 = vector.extract_strided_slice %27 {offsets = [0, 128], sizes = [8, 64], strides = [1, 1]} : vector<8x256xf32> to vector<8x64xf32>
    %32 = vector.extract_strided_slice %27 {offsets = [0, 192], sizes = [8, 64], strides = [1, 1]} : vector<8x256xf32> to vector<8x64xf32>
    %33 = arith.maximumf %31, %32 : vector<8x64xf32>
    %34 = arith.maximumf %30, %33 : vector<8x64xf32>
    %35 = tpu.concatenate %18, %34 in 1 : vector<8x64xf32>, vector<8x64xf32> -> vector<8x128xf32>
    %c0_6 = arith.constant 0 : index
    %c0_7 = arith.constant 0 : index
    %36 = vector.load %arg4[%c0_6, %c0_7] : memref<8x128xf32, #tpu.memory_space<vmem>>, vector<8x128xf32>
    tpu.vector_store %arg4[%c0_6, %c0_7], %35 {strides = array<i32>} : memref<8x128xf32, #tpu.memory_space<vmem>>, vector<8x128xf32>,
    return
  }
  func.func @transform_0(%arg0: i32) -> (i32, i32) {
    %c0_i32 = arith.constant 0 : i32
    %c0_i32_0 = arith.constant 0 : i32
    return %arg0, %c0_i32 : i32, i32
  }
  func.func @transform_1(%arg0: i32) -> (i32, i32) {
    %c0_i32 = arith.constant 0 : i32
    %c0_i32_0 = arith.constant 0 : i32
    return %arg0, %c0_i32 : i32, i32
  }
  func.func @transform_2(%arg0: i32) -> (i32, i32) {
    %c0_i32 = arith.constant 0 : i32
    %c0_i32_0 = arith.constant 0 : i32
    return %arg0, %c0_i32 : i32, i32
  }
  func.func @transform_3(%arg0: i32) -> (i32, i32) {
    %c0_i32 = arith.constant 0 : i32
    %c0_i32_0 = arith.constant 0 : i32
    return %arg0, %c0_i32 : i32, i32
  }
}

</mosaic_0001>

<bundles_post_ra>
// kernel: conv_block_forward.3
= control target key start
LH: loop header
LB: loop body
LE: loop exit
PB: predicated region body
PF: predicated region fallthrough
CT: control target
= control target key end

     0   :  { %v88_v0 = vmov 1   ;;  %v89_v2 = vmov 0   ;;  %vm76_vm0 = vcmask 523264   ;;  %s132_s1 = inlined_call_operand.vmem [shape: f32[8,2], index: 1, kind: input, shape index: {}]   ;;  %s133_s2 = inlined_call_operand.vmem [shape: f32[8,2], index: 2, kind: input, shape index: {}]   ;;  %s134_s0 = inlined_call_operand.vmem [shape: f32[8,512], index: 0, kind: input, shape index: {}]   ;;  %s135_s3 = inlined_call_operand.vmem [shape: f32[8,128], index: 3, kind: output, shape index: {}]  }
   0x1   :  { %86 = vset.pattern.permute.xlu0 %v88_v0  ;;  %v18_v1 = vld [vmem:[%s132_s1] sm:$0xff]  ;;  %87 = vset.pattern.permute.xlu1 %v89_v2  ;;  %v15_v5 = vld [vmem:[%s134_s0 + $0x8] sm:$0xff]  ;;  %v16_v7 = vld [vmem:[%s134_s0 + $0x10] sm:$0xff] }
   0x2   :  { %48 = vperm.xlu0 %86, %v18_v1   ;;  %22 = vperm.xlu1 %87, %v18_v1   ;;  %v19_v3 = vld [vmem:[%s133_s2] sm:$0xff]  ;;  %v17_v8 = vld [vmem:[%s134_s0 + $0x18] sm:$0xff]  ;;  %s90_s2 = smov 64  }
   0x3   :  { %v14_v4 = vld [vmem:[%s134_s0] sm:$0xff] }
   0x6   :  { %54 = vperm.xlu0 %86, %v19_v3   ;;  %29 = vperm.xlu1 %87, %v19_v3  }
  0x7d   :  { %v49_v6 = vpop.permute.xlu0 %48  ;;  %v23_v9 = vpop.permute.xlu1 %22 }
  0x7e   :  { %v25_v10 = vmul.f32 %v23_v9, %v14_v4  ;;  %v26_v11 = vmul.f32 %v23_v9, %v15_v5  ;;  %v51_v12 = vmul.f32 %v49_v6, %v16_v7  ;;  %v52_v13 = vmul.f32 %v49_v6, %v17_v8 }
  0x81   :  { %v55_v14 = vpop.permute.xlu0 %54  ;;  %v30_v15 = vpop.permute.xlu1 %29 }
  0x82   :  { %v57_v16 = vadd.f32 %v55_v14, %v51_v12  ;;  %v58_v17 = vadd.f32 %v55_v14, %v52_v13  ;;  %v32_v18 = vadd.f32 %v30_v15, %v25_v10  ;;  %v33_v19 = vadd.f32 %v30_v15, %v26_v11 }
  0x84   :  { %v59_v20 = vmax.f32 %v57_v16, 0.0  ;;  %v60_v21 = vmax.f32 %v58_v17, 0.0  ;;  %v34_v22 = vmax.f32 %v32_v18, 0.0  ;;  %v35_v23 = vmax.f32 %v33_v19, 0.0 }
  0x86   :  { %67 = vrot.lane.b32.xlu1 %v60_v21, %s90_s2  ;;  %62 = vrot.lane.b32.xlu0 %v59_v20, %s90_s2 }
  0x8a   :  { %42 = vrot.lane.b32.xlu1 %v35_v23, %s90_s2  ;;  %37 = vrot.lane.b32.xlu0 %v34_v22, %s90_s2 }
  0xf8   :  { %v68_v24 = vpop.permute.xlu1 %67  ;;  %v63_v25 = vpop.permute.xlu0 %62 }
  0xf9   :  { %v70_v26 = vmax.f32 %v60_v21, %v68_v24  ;;  %v65_v27 = vmax.f32 %v59_v20, %v63_v25 }
  0xfb   :  { %v71_v28 = vmax.f32 %v65_v27, %v70_v26 }
  0xfc   :  { %v43_v29 = vpop.permute.xlu1 %42  ;;  %v38_v30 = vpop.permute.xlu0 %37 }
  0xfd   :  { %73 = vrot.lane.b32.xlu0 %v71_v28, %s90_s2  ;;  %v45_v31 = vmax.f32 %v35_v23, %v43_v29  ;;  %v40_v32 = vmax.f32 %v34_v22, %v38_v30 }
  0xff   :  { %v46_v33 = vmax.f32 %v40_v32, %v45_v31 }
 0x16f   :  { %v74_v34 = vpop.permute.xlu0 %73 }
 0x170   :  { %v77_v35 = vsel %vm76_vm0, %v46_v33, %v74_v34 }
 0x171   :  { %78 = vst [vmem:[%s135_s3] sm:$0xff] %v77_v35 }

// kernel: conv_block_forward.2
= control target key start
LH: loop header
LB: loop body
LE: loop exit
PB: predicated region body
PF: predicated region fallthrough
CT: control target
= control target key end

     0   :  { %s488_s22 = smov 120   ;;  %s489_s27 = smov 56   ;;  %v491_v16 = vmov 0.0   ;;  %v492_v17 = vmov 0   ;;  %vm245_vm0 = vcmask 1043456   ;;  %vm64_vm1 = vcmask 523264   ;;  %s741_s0 = inlined_call_operand.vmem [shape: f32[2,4,2,4,72], index: 0, kind: input, shape index: {}]   ;;  %s742_s2 = inlined_call_operand.vmem [shape: f32[8,1], index: 2, kind: input, shape index: {}]   ;;  %s743_s1 = inlined_call_operand.vmem [shape: f32[8,36], index: 1, kind: input, shape index: {}]   ;;  %s744_s3 = inlined_call_operand.vmem [shape: f32[2,8,256], index: 3, kind: output, shape index: {0}]   ;;  %s745_s4 = inlined_call_operand.vmem [shape: f32[1,8,1], index: 4, kind: output, shape index: {1}]   ;;  %s746_s5 = inlined_call_operand.vmem [shape: f32[1,8,1], index: 5, kind: output, shape index: {2}]  }
   0x1   :  { %v526_v0 = vld [vmem:[%s741_s0 + $0x18] sm:$0xf]  ;;  %v531_v1 = vld [vmem:[%s741_s0 + $0x8] sm:$0xf]  ;;  %v540_v2 = vld [vmem:[%s741_s0 + $0x14] sm:$0xf]  ;;  %347 = vmatprep.mubr.f32.mxu0 %v491_v16  ;;  %418 = vmatprep.mubr.f32.mxu1 %v491_v16 }
   0x2   :  { %169 = vrot.lane.b32.xlu0 %v526_v0, %s488_s22  ;;  %125 = vrot.lane.b32.xlu1 %v531_v1, %s488_s22  ;;  %v545_v3 = vld [vmem:[%s741_s0 + $0x4] sm:$0xf]  ;;  %v465_v4 = vld [vmem:[%s741_s0 + $0x1c] sm:$0xf]  ;;  %s490_s11 = smov 64   ;;  %vm269_vm2 = vcmask 293888  }
   0x3   :  { %v461_v5 = vld [vmem:[%s741_s0 + $0xc] sm:$0xf]  ;;  %v566_v6 = vld [vmem:[%s741_s0 + $0x10] sm:$0xf]  ;;  %v575_v7 = vld [vmem:[%s741_s0] sm:$0xf]  ;;  %487 = vset.pattern.permute.xlu0 %v492_v17 }
   0x4   :  { %v583_v8 = vld [vmem:[%s741_s0 + $0x38] sm:$0xf]  ;;  %v592_v9 = vld [vmem:[%s741_s0 + $0x34] sm:$0xf]  ;;  %v601_v10 = vld [vmem:[%s741_s0 + $0x28] sm:$0xf] }
   0x5   :  { %v610_v11 = vld [vmem:[%s741_s0 + $0x24] sm:$0xf]  ;;  %v473_v12 = vld [vmem:[%s741_s0 + $0x3c] sm:$0xf]  ;;  %v469_v13 = vld [vmem:[%s741_s0 + $0x2c] sm:$0xf] }
   0x6   :  { %172 = vrot.lane.b32.xlu0 %v540_v2, %s489_s27  ;;  %128 = vrot.lane.b32.xlu1 %v545_v3, %s489_s27  ;;  %v628_v14 = vld [vmem:[%s741_s0 + $0x30] sm:$0xf]  ;;  %v642_v15 = vld [vmem:[%s741_s0 + $0x20] sm:$0xf]  ;;  %vm435_vm3 = vcmask 7168  }
   0x7   :  { %v263_v18 = vld [vmem:[%s742_s2] sm:$0xff] }
   0xa   :  { %183 = vrot.lane.b32.xlu0 %v540_v2, %s488_s22  ;;  %186 = vrot.lane.b32.xlu1 %v465_v4, %s489_s27 }
   0xe   :  { %139 = vrot.lane.b32.xlu0 %v545_v3, %s488_s22  ;;  %142 = vrot.lane.b32.xlu1 %v461_v5, %s489_s27 }
  0x12   :  { %154 = vrot.lane.b32.xlu0 %v566_v6, %s488_s22  ;;  %157 = vrot.lane.b32.xlu1 %v526_v0, %s489_s27 }
  0x16   :  { %94 = vrot.lane.b32.xlu0 %v465_v4, %s490_s11  ;;  %110 = vrot.lane.b32.xlu1 %v575_v7, %s488_s22 }
  0x1a   :  { %113 = vrot.lane.b32.xlu0 %v531_v1, %s489_s27  ;;  %175 = vrot.lane.b32.xlu1 %v583_v8, %s488_s22 }
  0x1e   :  { %178 = vrot.lane.b32.xlu0 %v592_v9, %s489_s27  ;;  %53 = vrot.lane.b32.xlu1 %v526_v0, %s490_s11 }
  0x22   :  { %74 = vrot.lane.b32.xlu0 %v540_v2, %s490_s11  ;;  %131 = vrot.lane.b32.xlu1 %v601_v10, %s488_s22 }
  0x26   :  { %134 = vrot.lane.b32.xlu0 %v610_v11, %s489_s27  ;;  %189 = vrot.lane.b32.xlu1 %v592_v9, %s488_s22 }
  0x2a   :  { %192 = vrot.lane.b32.xlu0 %v473_v12, %s489_s27  ;;  %145 = vrot.lane.b32.xlu1 %v610_v11, %s488_s22 }
  0x2e   :  { %148 = vrot.lane.b32.xlu0 %v469_v13, %s489_s27  ;;  %161 = vrot.lane.b32.xlu1 %v628_v14, %s488_s22 }
  0x32   :  { %164 = vrot.lane.b32.xlu0 %v583_v8, %s489_s27  ;;  %70 = vrot.lane.b32.xlu1 %v545_v3, %s490_s11 }
  0x36   :  { %90 = vrot.lane.b32.xlu0 %v461_v5, %s490_s11  ;;  %102 = vrot.lane.b32.xlu1 %v473_v12, %s490_s11 }
  0x3a   :  { %117 = vrot.lane.b32.xlu0 %v642_v15, %s488_s22  ;;  %120 = vrot.lane.b32.xlu1 %v601_v10, %s489_s27 }
  0x3e   :  { %49 = vrot.lane.b32.xlu0 %v531_v1, %s490_s11  ;;  %61 = vrot.lane.b32.xlu1 %v583_v8, %s490_s11 }
  0x42   :  { %82 = vrot.lane.b32.xlu0 %v592_v9, %s490_s11  ;;  %78 = vrot.lane.b32.xlu1 %v610_v11, %s490_s11 }
  0x46   :  { %98 = vrot.lane.b32.xlu0 %v469_v13, %s490_s11  ;;  %57 = vrot.lane.b32.xlu1 %v601_v10, %s490_s11 }
  0x4a   :  { %266 = vperm.xlu0 %487, %v263_v18  }
  0x74   :  { %v170_v19 = vpop.permute.xlu0 %169  ;;  %v126_v20 = vpop.permute.xlu1 %125 }
  0x78   :  { %v173_v21 = vpop.permute.xlu0 %172  ;;  %v129_v22 = vpop.permute.xlu1 %128 }
  0x79   :  { %v181_v28 = vsel %vm64_vm1, %v170_v19, %v173_v21  ;;  %v137_v37 = vsel %vm64_vm1, %v126_v20, %v129_v22 }
  0x7a   :  { %v238_v30 = vrot.slane %v181_v28, 4  ;;  %v237_v39 = vrot.slane %v137_v37, 4 }
  0x7c   :  { %v184_v23 = vpop.permute.xlu0 %183  ;;  %v187_v24 = vpop.permute.xlu1 %186 }
  0x7d   :  { %v195_v25 = vsel %vm64_vm1, %v184_v23, %v187_v24 }
  0x7e   :  { %474 = vmatprep.subr.msk.mxu0 %vm245_vm0, %v195_v25 }
  0x80   :  { %v140_v26 = vpop.permute.xlu0 %139  ;;  %v143_v27 = vpop.permute.xlu1 %142 }
  0x81   :  { %v151_v29 = vsel %vm64_vm1, %v140_v26, %v143_v27 }
  0x82   :  { %475 = vmatpush1.msk.msra.mxu0 %vm245_vm0, %v151_v29  ;;  %v226_v38 = vrot.slane %v151_v29, 4 }
  0x84   :  { %v155_v31 = vpop.permute.xlu0 %154  ;;  %v158_v32 = vpop.permute.xlu1 %157  ;;  %v255_v44 = vsel %vm245_vm0, %v137_v37, %v226_v38 }
  0x85   :  { %v167_v33 = vsel %vm64_vm1, %v155_v31, %v158_v32 }
  0x86   :  { %v259_v34 = vsel %vm245_vm0, %v167_v33, %v238_v30 }
  0x87   :  { %307 = vmatprep.subr.mxu0 %v259_v34 }
  0x88   :  { %v95_v35 = vpop.permute.xlu0 %94  ;;  %v111_v36 = vpop.permute.xlu1 %110 }
  0x89   :  { %v106_v47 = vsel %vm64_vm1, %v540_v2, %v95_v35 }
  0x8a   :  { %v225_v49 = vrot.slane %v106_v47, 4 }
  0x8c   :  { %v114_v40 = vpop.permute.xlu0 %113  ;;  %v176_v41 = vpop.permute.xlu1 %175 }
  0x8d   :  { %v123_v42 = vsel %vm64_vm1, %v111_v36, %v114_v40 }
  0x8e   :  { %v258_v43 = vsel %vm245_vm0, %v123_v42, %v237_v39  ;;  %v214_v48 = vrot.slane %v123_v42, 4 }
  0x8f   :  { %308 = vmatpush1.msra.mxu0 %v258_v43 }
  0x90   :  { %v179_v45 = vpop.permute.xlu0 %178  ;;  %309 = vmatprep.subr.mxu0 %v255_v44  ;;  %v54_v46 = vpop.permute.xlu1 %53  ;;  %v251_v54 = vsel %vm245_vm0, %v106_v47, %v214_v48 }
  0x91   :  { %v182_v62 = vsel %vm64_vm1, %v176_v41, %v179_v45  ;;  %v66_v5 = vsel %vm64_vm1, %v566_v6, %v54_v46 }
  0x92   :  { %v213_v17 = vrot.slane %v66_v5, 4 }
  0x94   :  { %v75_v50 = vpop.permute.xlu0 %74  ;;  %v132_v51 = vpop.permute.xlu1 %131 }
  0x95   :  { %v86_v52 = vsel %vm64_vm1, %v526_v0, %v75_v50  ;;  %v240_v0 = vrot.slane %v182_v62, 4 }
  0x96   :  { %v254_v53 = vsel %vm245_vm0, %v86_v52, %v225_v49  ;;  %v202_v16 = vrot.slane %v86_v52, 4 }
  0x97   :  { %310 = vmatpush1.msra.mxu0 %v254_v53 }
  0x98   :  { %v135_v55 = vpop.permute.xlu0 %134  ;;  %311 = vmatprep.subr.mxu0 %v251_v54  ;;  %v190_v56 = vpop.permute.xlu1 %189  ;;  %v247_v6 = vsel %vm245_vm0, %v66_v5, %v202_v16 }
  0x99   :  { %v138_v20 = vsel %vm64_vm1, %v132_v51, %v135_v55 }
  0x9a   :  { %v239_v24 = vrot.slane %v138_v20, 4 }
  0x9c   :  { %v193_v57 = vpop.permute.xlu0 %192  ;;  %v146_v58 = vpop.permute.xlu1 %145 }
  0x9d   :  { %v196_v59 = vsel %vm64_vm1, %v190_v56, %v193_v57 }
  0x9e   :  { %477 = vmatprep.subr.msk.mxu1 %vm245_vm0, %v196_v59 }
  0xa0   :  { %v149_v60 = vpop.permute.xlu0 %148  ;;  %v162_v61 = vpop.permute.xlu1 %161 }
  0xa1   :  { %v152_v63 = vsel %vm64_vm1, %v146_v58, %v149_v60 }
  0xa2   :  { %478 = vmatpush1.msk.msra.mxu1 %vm245_vm0, %v152_v63  ;;  %v228_v23 = vrot.slane %v152_v63, 4 }
  0xa4   :  { %v165_v2 = vpop.permute.xlu0 %164  ;;  %v71_v4 = vpop.permute.xlu1 %70 }
  0xa5   :  { %v168_v12 = vsel %vm64_vm1, %v162_v61, %v165_v2  ;;  %v85_v27 = vsel %vm64_vm1, %v531_v1, %v71_v4  ;;  %v262_v1 = vld [vmem:[%s743_s1] sm:$0xff] }
  0xa6   :  { %v261_v13 = vsel %vm245_vm0, %v168_v12, %v240_v0  ;;  %v201_v30 = vrot.slane %v85_v27, 4 }
  0xa7   :  { %378 = vmatprep.subr.mxu1 %v261_v13 }
  0xa8   :  { %v91_v18 = vpop.permute.xlu0 %90  ;;  %v103_v19 = vpop.permute.xlu1 %102 }
  0xa9   :  { %v105_v21 = vsel %vm64_vm1, %v545_v3, %v91_v18  ;;  %v257_v3 = vsel %vm245_vm0, %v138_v20, %v228_v23  ;;  %v108_v33 = vsel %vm64_vm1, %v592_v9, %v103_v19 }
  0xaa   :  { %v250_v22 = vsel %vm245_vm0, %v105_v21, %v213_v17  ;;  %v227_v37 = vrot.slane %v108_v33, 4 }
  0xab   :  { %312 = vmatpush1.msra.mxu0 %v250_v22 }
  0xac   :  { %v118_v25 = vpop.permute.xlu0 %117  ;;  %313 = vmatprep.subr.mxu0 %v247_v6  ;;  %v121_v26 = vpop.permute.xlu1 %120 }
  0xad   :  { %v124_v28 = vsel %vm64_vm1, %v118_v25, %v121_v26 }
  0xae   :  { %v260_v29 = vsel %vm245_vm0, %v124_v28, %v239_v24  ;;  %v216_v36 = vrot.slane %v124_v28, 4 }
  0xaf   :  { %379 = vmatpush1.msra.mxu1 %v260_v29 }
  0xb0   :  { %v50_v31 = vpop.permute.xlu0 %49  ;;  %380 = vmatprep.subr.mxu1 %v257_v3  ;;  %v62_v32 = vpop.permute.xlu1 %61  ;;  %v253_v43 = vsel %vm245_vm0, %v108_v33, %v216_v36 }
  0xb1   :  { %v65_v34 = vsel %vm64_vm1, %v575_v7, %v50_v31  ;;  %v68_v9 = vsel %vm64_vm1, %v628_v14, %v62_v32 }
  0xb2   :  { %v246_v35 = vsel %vm245_vm0, %v65_v34, %v201_v30  ;;  %v215_v44 = vrot.slane %v68_v9, 4 }
  0xb3   :  { %314 = vmatpush1.msra.mxu0 %v246_v35 }
  0xb4   :  { %v83_v38 = vpop.permute.xlu0 %82  ;;  %v79_v39 = vpop.permute.xlu1 %78  ;;  %476 = vmatmul.mubr.msk.f32.vlgmr.msra.gmra.mxu0 %vm269_vm2, %v262_v1 }
  0xb5   :  { %v88_v7 = vsel %vm64_vm1, %v583_v8, %v83_v38  ;;  %v87_v40 = vsel %vm64_vm1, %v601_v10, %v79_v39 }
  0xb6   :  { %v256_v41 = vsel %vm245_vm0, %v88_v7, %v227_v37  ;;  %v204_v42 = vrot.slane %v88_v7, 4  ;;  %v203_v45 = vrot.slane %v87_v40, 4 }
  0xb7   :  { %381 = vmatpush1.msra.mxu1 %v256_v41 }
  0xb8   :  { %v99_v46 = vpop.permute.xlu0 %98  ;;  %382 = vmatprep.subr.mxu1 %v253_v43  ;;  %v58_v47 = vpop.permute.xlu1 %57  ;;  %v249_v10 = vsel %vm245_vm0, %v68_v9, %v204_v42 }
  0xb9   :  { %v107_v14 = vsel %vm64_vm1, %v610_v11, %v99_v46  ;;  %v67_v8 = vsel %vm64_vm1, %v642_v15, %v58_v47 }
  0xba   :  { %v252_v48 = vsel %vm245_vm0, %v107_v14, %v215_v44  ;;  %v248_v49 = vsel %vm245_vm0, %v67_v8, %v203_v45 }
  0xbb   :  { %383 = vmatpush1.msra.mxu1 %v252_v48 }
  0xbc   :  { %384 = vmatprep.subr.mxu1 %v249_v10 }
  0xbd   :  { %385 = vmatpush1.msra.mxu1 %v248_v49 }
  0xbe   :  { %479 = vmatmul.mubr.msk.f32.vlgmr.msra.gmra.mxu1 %vm269_vm2, %v262_v1 }
  0xc5   :  { %v267_v50 = vpop.permute.xlu0 %266 }
 0x174   :  { %v349_v51 = vpop.f32.mrf.mxu0 }
 0x175   :  { %v350_v52 = vadd.f32 %v349_v51, %v267_v50 }
 0x176   :  { %v351_v53 = vpop.f32.mrf.mxu0 }
 0x177   :  { %v352_v54 = vadd.f32 %v351_v53, %v267_v50  ;;  %425 = vst [vmem:[%s744_s3] sm:$0xff] %v350_v52  ;;  %v437_v15 = vmul.f32 %v350_v52, %v350_v52 }
 0x179   :  { %426 = vst [vmem:[%s744_s3 + $0x8] sm:$0xff] %v352_v54  ;;  %v438_v11 = vmul.f32 %v352_v54, %v352_v54  ;;  %v430_v56 = vadd.f32 %v352_v54, %v350_v52 }
 0x17b   :  { %v441_v62 = vadd.f32 %v438_v11, %v437_v15 }
 0x17e   :  { %v420_v55 = vpop.f32.mrf.mxu1 }
 0x17f   :  { %v421_v57 = vadd.f32 %v420_v55, %v267_v50 }
 0x180   :  { %v422_v58 = vpop.f32.mrf.mxu1 }
 0x181   :  { %480 = vst [vmem:[%s744_s3 + $0x10] sm:$0xff] %v421_v57  ;;  %v439_v59 = vmul.f32 %v421_v57, %v421_v57  ;;  %v423_v60 = vadd.f32 %v422_v58, %v267_v50  ;;  %v431_v61 = vadd.f32 %v430_v56, %v421_v57 }
 0x183   :  { %481 = vst [vmem:[%s744_s3 + $0x18] sm:$0xff] %v423_v60  ;;  %v432_v63 = vadd.f32 %v431_v61, %v423_v60  ;;  %v440_v0 = vmul.f32 %v423_v60, %v423_v60  ;;  %v442_v2 = vadd.f32 %v441_v62, %v439_v59 }
 0x185   :  { %433 = vadd.xlane.f32.xlu1 %v432_v63  ;;  %v443_v4 = vadd.f32 %v442_v2, %v440_v0 }
 0x187   :  { %444 = vadd.xlane.f32.xlu0 %v443_v4 }
 0x20e   :  { %v434_v5 = vpop.xlane.xlu1 %433 }
 0x20f   :  { %436 = vst.msk [vmem:[%s745_s4] sm:$0xff] %vm435_vm3, %v434_v5 }
 0x210   :  { %v445_v12 = vpop.xlane.xlu0 %444 }
 0x211   :  { %446 = vst.msk [vmem:[%s746_s5] sm:$0xff] %vm435_vm3, %v445_v12 }

</bundles_post_ra>
